<compile_context>
chip_gen: v5e
topology: v5e:2x2
jax: 0.10.0
libtpu: 0.0.40
codegen_flags: <defaults>
</compile_context>

<pallas_src>
import math
import jax
import jax.numpy as jnp
from jax.experimental import pallas as pl
from jax.experimental.pallas import tpu as pltpu

LANE = 128


def _round_up(n, m):
    return ((n + m - 1) // m) * m


def _min_sublane(dtype):
    # bf16 packs 16 rows per vreg sublane tile; f32 packs 8.
    return 16 if jnp.dtype(dtype) == jnp.dtype(jnp.bfloat16) else 8


def _num_tensorcores():
    # v7x has 2 TensorCores per chip sharing the grid; v5e/v6e have 1.
    try:
        kind = jax.devices()[0].device_kind.lower()
    except Exception:
        return 1
    return 2 if "v7" in kind else 1


def mlp_kernel(x_ref, w0_ref, b0_ref, w1_ref, b1_ref, w2_ref, b2_ref,
               w3_ref, b3_ref, o_ref):
    # Whole 4-layer forward for one batch tile, entirely in VMEM.
    # Dots hit the MXU with f32 accumulation; bias+ReLU stay in f32 on the VPU.
    h = jnp.dot(x_ref[...], w0_ref[...],
                preferred_element_type=jnp.float32) + b0_ref[...]
    h = jnp.maximum(h, 0.0)

    h = jnp.dot(h.astype(w1_ref.dtype), w1_ref[...],
                preferred_element_type=jnp.float32) + b1_ref[...]
    h = jnp.maximum(h, 0.0)

    h = jnp.dot(h.astype(w2_ref.dtype), w2_ref[...],
                preferred_element_type=jnp.float32) + b2_ref[...]
    h = jnp.maximum(h, 0.0)

    out = jnp.dot(h.astype(w3_ref.dtype), w3_ref[...],
                  preferred_element_type=jnp.float32) + b3_ref[...]
    o_ref[...] = out.astype(o_ref.dtype)


def prepare_params(params, *, compute_dtype=jnp.float32):
    """One-time preparation (call at init, NOT per forward).

    params: list of (W_t, b) with W_t (fan_in, fan_out), b (1, fan_out)
            (i.e. weights already transposed vs. PyTorch's (out, in)).
    Returns (layers, out_dim) where each layer is (W_padded, b_padded):
      * layer 0 keeps its native fan_in (x is passed unpadded);
      * every fan_out (and hence subsequent fan_in) is padded to 128 lanes;
      * padding is zero, so the forward pass is numerically exact;
      * weights in compute_dtype, biases always f32.
    """
    out_dim = params[-1][0].shape[1]
    layers = []
    prev_fo_p = None
    for idx, (w, b) in enumerate(params):
        fi, fo = w.shape
        fi_p = fi if idx == 0 else prev_fo_p
        fo_p = _round_up(fo, LANE)
        w_p = jnp.zeros((fi_p, fo_p), compute_dtype).at[:fi, :fo].set(
            w.astype(compute_dtype))
        b_p = jnp.zeros((1, fo_p), jnp.float32).at[:, :fo].set(
            b.astype(jnp.float32))
        layers.append((w_p, b_p))
        prev_fo_p = fo_p
    return layers, out_dim


def _pick_tile_b(B, *, sublane=8, n_cores=1, max_tile=2048):
    """Batch tile (multiple of the dtype's sublane tile, capped at max_tile).

    1-TC chips (v5e/v6e): one grid step whenever the batch fits the cap
    (grid splitting is a sequential loop there -- pure per-step overhead).
    2-TC chips (v7x): even number of 'parallel' steps so both cores get
    equal work.
    """
    Bp = _round_up(max(B, sublane), sublane)
    if n_cores <= 1:
        if Bp <= max_tile:
            return Bp
        steps = pl.cdiv(Bp, max_tile)
    else:
        steps = 2 * pl.cdiv(Bp, 2 * max_tile)
    return _round_up(pl.cdiv(Bp, steps), sublane)


def net_forward(x, prepared, *, tile_b=None, compute_dtype=jnp.float32):
    """x: (B, in_size) at native width.  prepared: output of prepare_params."""
    layers, out_dim = prepared
    assert len(layers) == 4
    B, in_size = x.shape

    sublane = _min_sublane(compute_dtype)
    if tile_b is None:
        tile_b = _pick_tile_b(B, sublane=sublane, n_cores=_num_tensorcores())
    assert tile_b % sublane == 0

    # Only the batch dim may need padding (and only when B % tile_b != 0).
    B_p = _round_up(B, tile_b)
    x_c = x.astype(compute_dtype)
    if B_p != B:
        x_c = jnp.zeros((B_p, in_size), compute_dtype).at[:B, :].set(x_c)

    (w0, b0), (w1, b1), (w2, b2), (w3, b3) = layers
    out_p = w3.shape[1]          # padded output width (multiple of 128)
    grid = (B_p // tile_b,)

    # Weights/biases are small and identical every step: constant index map
    # -> no re-DMA across grid iterations.
    def const_spec(arr):
        return pl.BlockSpec(arr.shape, lambda i: (0, 0))

    out_padded = pl.pallas_call(
        mlp_kernel,
        out_shape=jax.ShapeDtypeStruct((B_p, out_p), x.dtype),
        grid_spec=pltpu.PrefetchScalarGridSpec(
            num_scalar_prefetch=0,
            grid=grid,
            in_specs=[
                # x tile at native in_size width (last dim == full array dim).
                pl.BlockSpec((tile_b, in_size), lambda i: (i, 0)),
                const_spec(w0), const_spec(b0),
                const_spec(w1), const_spec(b1),
                const_spec(w2), const_spec(b2),
                const_spec(w3), const_spec(b3),
            ],
            out_specs=pl.BlockSpec((tile_b, out_p), lambda i: (i, 0)),
        ),
        compiler_params=pltpu.CompilerParams(
            dimension_semantics=("parallel",),
            vmem_limit_bytes=32 * 1024 * 1024,
        ),
    )(x_c, w0, b0, w1, b1, w2, b2, w3, b3)

    # Strip batch/output padding.
    return out_padded[:B, :out_dim]


def init_linear(key, fan_in, fan_out):
    """Deterministic init mimicking torch.nn.Linear default (uniform +/- 1/sqrt(fan_in)).
    Weight is stored transposed as (fan_in, fan_out); bias as (1, fan_out)."""
    kw, kb = jax.random.split(key)
    bound = 1.0 / math.sqrt(fan_in)
    w_t = jax.random.uniform(kw, (fan_in, fan_out), jnp.float32, -bound, bound)
    b = jax.random.uniform(kb, (1, fan_out), jnp.float32, -bound, bound)
    return w_t, b


def reference_forward(x, params):
    h = x
    for idx, (w, b) in enumerate(params):
        h = h @ w + b
        if idx < len(params) - 1:
            h = jnp.maximum(h, 0.0)
    return h


if __name__ == "__main__":
    # Shapes consistent with the module's forward (small, deterministic).
    in_size, L0, L1, L2 = 32, 64, 64, 32
    batch = 256  # 1-TC chips: tile_b=256, grid=(1,); v7x: tile_b=128, grid=(2,)

    key = jax.random.PRNGKey(0)
    kx, k0, k1, k2, k3 = jax.random.split(key, 5)

    x = jax.random.normal(kx, (batch, in_size), jnp.float32)
    params = [
        init_linear(k0, in_size, L0),
        init_linear(k1, L0, L1),
        init_linear(k2, L1, L2),
        init_linear(k3, L2, 1),
    ]

    # Pad/transpose the params ONCE (outside the per-call hot path).
    # f32 compute keeps the allclose check tight on every generation; pass
    # compute_dtype=jnp.bfloat16 on v6e/v7x for higher MXU/DMA throughput
    # (then loosen the tolerance to ~2e-2 vs the f32 reference).
    compute_dtype = jnp.float32
    prepared = prepare_params(params, compute_dtype=compute_dtype)

    fwd = jax.jit(lambda xin: net_forward(xin, prepared,
                                          compute_dtype=compute_dtype))
    out = jax.block_until_ready(fwd(x))

    ref = reference_forward(x, params)
    assert out.shape == (batch, 1)
    assert jnp.allclose(out, ref, atol=1e-4, rtol=1e-4), "mismatch vs reference"

    print("KERNEL_OK")
</pallas_src>

<mosaic_0001>
module attributes {stable_mosaic.version = 11 : i64} {
  func.func @mlp_kernel(%arg0: i32, %arg1: memref<256x32xf32, #tpu.memory_space<vmem>>, %arg2: memref<32x128xf32, #tpu.memory_space<vmem>>, %arg3: memref<1x128xf32, #tpu.memory_space<vmem>>, %arg4: memref<128x128xf32, #tpu.memory_space<vmem>>, %arg5: memref<1x128xf32, #tpu.memory_space<vmem>>, %arg6: memref<128x128xf32, #tpu.memory_space<vmem>>, %arg7: memref<1x128xf32, #tpu.memory_space<vmem>>, %arg8: memref<128x128xf32, #tpu.memory_space<vmem>>, %arg9: memref<1x128xf32, #tpu.memory_space<vmem>>, %arg10: memref<256x128xf32, #tpu.memory_space<vmem>>) attributes {dimension_semantics = [#tpu.dimension_semantics<parallel>], iteration_bounds = array<i64: 1>, scalar_prefetch = 0 : i64, scratch_operands = 0 : i64, tpu.core_type = #tpu.core_type<tc>, window_params = [{transform_indices = @transform_0, window_bounds = array<i64: 256, 32>}, {pipeline_mode = #tpu.pipeline_mode<synchronous>, transform_indices = @transform_1, window_bounds = array<i64: 32, 128>}, {pipeline_mode = #tpu.pipeline_mode<synchronous>, transform_indices = @transform_2, window_bounds = array<i64: 1, 128>}, {pipeline_mode = #tpu.pipeline_mode<synchronous>, transform_indices = @transform_3, window_bounds = array<i64: 128, 128>}, {pipeline_mode = #tpu.pipeline_mode<synchronous>, transform_indices = @transform_4, window_bounds = array<i64: 1, 128>}, {pipeline_mode = #tpu.pipeline_mode<synchronous>, transform_indices = @transform_5, window_bounds = array<i64: 128, 128>}, {pipeline_mode = #tpu.pipeline_mode<synchronous>, transform_indices = @transform_6, window_bounds = array<i64: 1, 128>}, {pipeline_mode = #tpu.pipeline_mode<synchronous>, transform_indices = @transform_7, window_bounds = array<i64: 128, 128>}, {pipeline_mode = #tpu.pipeline_mode<synchronous>, transform_indices = @transform_8, window_bounds = array<i64: 1, 128>}, {transform_indices = @transform_9, window_bounds = array<i64: 256, 128>}]} {
    %c0 = arith.constant 0 : index
    %c0_0 = arith.constant 0 : index
    %0 = vector.load %arg1[%c0, %c0_0] : memref<256x32xf32, #tpu.memory_space<vmem>>, vector<256x32xf32>
    %c0_1 = arith.constant 0 : index
    %c0_2 = arith.constant 0 : index
    %1 = vector.load %arg2[%c0_1, %c0_2] : memref<32x128xf32, #tpu.memory_space<vmem>>, vector<32x128xf32>
    %cst = arith.constant dense<0.000000e+00> : vector<256x128xf32>
    %2 = tpu.matmul %0, %1, %cst {dimension_numbers = #tpu.dot_dimension_numbers<[1], [0], [0], [1], [0, 0, 1, 1], [], []>} : vector<256x32xf32>, vector<32x128xf32>, vector<256x128xf32> -> vector<256x128xf32>
    %c0_3 = arith.constant 0 : index
    %c0_4 = arith.constant 0 : index
    %3 = vector.load %arg3[%c0_3, %c0_4] : memref<1x128xf32, #tpu.memory_space<vmem>>, vector<1x128xf32>
    %4 = vector.broadcast %3 : vector<1x128xf32> to vector<256x128xf32>
    %5 = arith.addf %2, %4 : vector<256x128xf32>
    %cst_5 = arith.constant 0.000000e+00 : f32
    %6 = vector.broadcast %cst_5 : f32 to vector<256x128xf32>
    %7 = arith.maximumf %5, %6 : vector<256x128xf32>
    %c0_6 = arith.constant 0 : index
    %c0_7 = arith.constant 0 : index
    %8 = vector.load %arg4[%c0_6, %c0_7] : memref<128x128xf32, #tpu.memory_space<vmem>>, vector<128x128xf32>
    %cst_8 = arith.constant dense<0.000000e+00> : vector<256x128xf32>
    %9 = tpu.matmul %7, %8, %cst_8 {dimension_numbers = #tpu.dot_dimension_numbers<[1], [0], [0], [1], [0, 0, 1, 1], [], []>} : vector<256x128xf32>, vector<128x128xf32>, vector<256x128xf32> -> vector<256x128xf32>
    %c0_9 = arith.constant 0 : index
    %c0_10 = arith.constant 0 : index
    %10 = vector.load %arg5[%c0_9, %c0_10] : memref<1x128xf32, #tpu.memory_space<vmem>>, vector<1x128xf32>
    %11 = vector.broadcast %10 : vector<1x128xf32> to vector<256x128xf32>
    %12 = arith.addf %9, %11 : vector<256x128xf32>
    %cst_11 = arith.constant 0.000000e+00 : f32
    %13 = vector.broadcast %cst_11 : f32 to vector<256x128xf32>
    %14 = arith.maximumf %12, %13 : vector<256x128xf32>
    %c0_12 = arith.constant 0 : index
    %c0_13 = arith.constant 0 : index
    %15 = vector.load %arg6[%c0_12, %c0_13] : memref<128x128xf32, #tpu.memory_space<vmem>>, vector<128x128xf32>
    %cst_14 = arith.constant dense<0.000000e+00> : vector<256x128xf32>
    %16 = tpu.matmul %14, %15, %cst_14 {dimension_numbers = #tpu.dot_dimension_numbers<[1], [0], [0], [1], [0, 0, 1, 1], [], []>} : vector<256x128xf32>, vector<128x128xf32>, vector<256x128xf32> -> vector<256x128xf32>
    %c0_15 = arith.constant 0 : index
    %c0_16 = arith.constant 0 : index
    %17 = vector.load %arg7[%c0_15, %c0_16] : memref<1x128xf32, #tpu.memory_space<vmem>>, vector<1x128xf32>
    %18 = vector.broadcast %17 : vector<1x128xf32> to vector<256x128xf32>
    %19 = arith.addf %16, %18 : vector<256x128xf32>
    %cst_17 = arith.constant 0.000000e+00 : f32
    %20 = vector.broadcast %cst_17 : f32 to vector<256x128xf32>
    %21 = arith.maximumf %19, %20 : vector<256x128xf32>
    %c0_18 = arith.constant 0 : index
    %c0_19 = arith.constant 0 : index
    %22 = vector.load %arg8[%c0_18, %c0_19] : memref<128x128xf32, #tpu.memory_space<vmem>>, vector<128x128xf32>
    %cst_20 = arith.constant dense<0.000000e+00> : vector<256x128xf32>
    %23 = tpu.matmul %21, %22, %cst_20 {dimension_numbers = #tpu.dot_dimension_numbers<[1], [0], [0], [1], [0, 0, 1, 1], [], []>} : vector<256x128xf32>, vector<128x128xf32>, vector<256x128xf32> -> vector<256x128xf32>
    %c0_21 = arith.constant 0 : index
    %c0_22 = arith.constant 0 : index
    %24 = vector.load %arg9[%c0_21, %c0_22] : memref<1x128xf32, #tpu.memory_space<vmem>>, vector<1x128xf32>
    %25 = vector.broadcast %24 : vector<1x128xf32> to vector<256x128xf32>
    %26 = arith.addf %23, %25 : vector<256x128xf32>
    %c0_23 = arith.constant 0 : index
    %c0_24 = arith.constant 0 : index
    %27 = vector.load %arg10[%c0_23, %c0_24] : memref<256x128xf32, #tpu.memory_space<vmem>>, vector<256x128xf32>
    tpu.vector_store %arg10[%c0_23, %c0_24], %26 {strides = array<i32>} : memref<256x128xf32, #tpu.memory_space<vmem>>, vector<256x128xf32>,
    return
  }
  func.func @transform_0(%arg0: i32) -> (i32, i32) {
    %c0_i32 = arith.constant 0 : i32
    %c0_i32_0 = arith.constant 0 : i32
    return %arg0, %c0_i32 : i32, i32
  }
  func.func @transform_1(%arg0: i32) -> (i32, i32) {
    %c0_i32 = arith.constant 0 : i32
    %c0_i32_0 = arith.constant 0 : i32
    %c0_i32_1 = arith.constant 0 : i32
    return %c0_i32, %c0_i32_0 : i32, i32
  }
  func.func @transform_2(%arg0: i32) -> (i32, i32) {
    %c0_i32 = arith.constant 0 : i32
    %c0_i32_0 = arith.constant 0 : i32
    %c0_i32_1 = arith.constant 0 : i32
    return %c0_i32, %c0_i32_0 : i32, i32
  }
  func.func @transform_3(%arg0: i32) -> (i32, i32) {
    %c0_i32 = arith.constant 0 : i32
    %c0_i32_0 = arith.constant 0 : i32
    %c0_i32_1 = arith.constant 0 : i32
    return %c0_i32, %c0_i32_0 : i32, i32
  }
  func.func @transform_4(%arg0: i32) -> (i32, i32) {
    %c0_i32 = arith.constant 0 : i32
    %c0_i32_0 = arith.constant 0 : i32
    %c0_i32_1 = arith.constant 0 : i32
    return %c0_i32, %c0_i32_0 : i32, i32
  }
  func.func @transform_5(%arg0: i32) -> (i32, i32) {
    %c0_i32 = arith.constant 0 : i32
    %c0_i32_0 = arith.constant 0 : i32
    %c0_i32_1 = arith.constant 0 : i32
    return %c0_i32, %c0_i32_0 : i32, i32
  }
  func.func @transform_6(%arg0: i32) -> (i32, i32) {
    %c0_i32 = arith.constant 0 : i32
    %c0_i32_0 = arith.constant 0 : i32
    %c0_i32_1 = arith.constant 0 : i32
    return %c0_i32, %c0_i32_0 : i32, i32
  }
  func.func @transform_7(%arg0: i32) -> (i32, i32) {
    %c0_i32 = arith.constant 0 : i32
    %c0_i32_0 = arith.constant 0 : i32
    %c0_i32_1 = arith.constant 0 : i32
    return %c0_i32, %c0_i32_0 : i32, i32
  }
  func.func @transform_8(%arg0: i32) -> (i32, i32) {
    %c0_i32 = arith.constant 0 : i32
    %c0_i32_0 = arith.constant 0 : i32
    %c0_i32_1 = arith.constant 0 : i32
    return %c0_i32, %c0_i32_0 : i32, i32
  }
  func.func @transform_9(%arg0: i32) -> (i32, i32) {
    %c0_i32 = arith.constant 0 : i32
    %c0_i32_0 = arith.constant 0 : i32
    return %arg0, %c0_i32 : i32, i32
  }
}

</mosaic_0001>

<bundles_post_ra>
// kernel: _lambda_.1
= control target key start
LH: loop header
LB: loop body
LE: loop exit
PB: predicated region body
PF: predicated region fallthrough
CT: control target
= control target key end

     0   :  { %14 = vsyncpa [#allocation3], 0  ;;  %s895_s12 = smov [#allocation2]   ;;  %s896_s14 = smov 128   ;;  %s1431_s0 = inlined_call_operand.vmem [shape: f32[256,32], index: 0, kind: input, shape index: {}]   ;;  %s1432_s1 = inlined_call_operand.vmem [shape: f32[32,128], index: 1, kind: input, shape index: {}]   ;;  %s1433_s2 = inlined_call_operand.vmem [shape: f32[1,128], index: 2, kind: input, shape index: {}]   ;;  %s1434_s3 = inlined_call_operand.hbm [shape: f32[128,128], index: 3, kind: input, shape index: {}]   ;;  %s1435_s4 = inlined_call_operand.vmem [shape: f32[1,128], index: 4, kind: input, shape index: {}]   ;;  %s1436_s5 = inlined_call_operand.vmem [shape: f32[128,128], index: 5, kind: input, shape index: {}]   ;;  %s1437_s6 = inlined_call_operand.vmem [shape: f32[1,128], index: 6, kind: input, shape index: {}]   ;;  %s1438_s7 = inlined_call_operand.vmem [shape: f32[128,128], index: 7, kind: input, shape index: {}]   ;;  %s1439_s8 = inlined_call_operand.vmem [shape: f32[1,128], index: 8, kind: input, shape index: {}]   ;;  %s1440_s9 = inlined_call_operand.vmem [shape: f32[256,128], index: 9, kind: output, shape index: {}]  }
   0x1   :  { %s25_s11 = sshll.u32 %s1434_s3, 4  ;;  %s27_s13 = sshll.u32 %s895_s12, 4  ;;  %s26_s11 = int_to_ptr.hbm [resolvable:$true] %s25_s11  ;;  %s28_s13 = int_to_ptr.vmem [resolvable:$true] %s27_s13 }
   0x2   :  { %s897_s15 = smov 8  }
   0x3   :  { %33 = dma.hbm_to_vmem [thread:$0]  %s26_s11, 2048, %s28_s13, [#allocation3], %s896_s14, %s896_s14, %s897_s15  }
   0x4   :  { %893 = dma.done.wait [#allocation3], 2048  }
   0x5   :  { %894 = vsyncadd [#allocation3], 4294965248  ;;  %v83_v0 = vld [vmem:[%s1432_s1 + $0x18] sm:$0xff]  ;;  %v82_v1 = vld [vmem:[%s1432_s1 + $0x10] sm:$0xff]  ;;  %vm88_vm0 = vcmask 261120  }
   0x6   :  { %197 = vmatpush.msra.mxu0 %v83_v0  ;;  %v81_v2 = vld [vmem:[%s1432_s1 + $0x8] sm:$0xff]  ;;  %v80_v3 = vld [vmem:[%s1432_s1] sm:$0xff]  ;;  %v50_v6 = vld [vmem:[%s1431_s0 + $0x10] sm:$0xff] }
   0x7   :  { %v48_v4 = vld [vmem:[%s1431_s0] sm:$0xff]  ;;  %v49_v5 = vld [vmem:[%s1431_s0 + $0x8] sm:$0xff]  ;;  %v51_v7 = vld [vmem:[%s1431_s0 + $0x18] sm:$0xff] }
   0x8   :  { %198 = vmatpush.msra.mxu0 %v82_v1  ;;  %v52_v8 = vld [vmem:[%s1431_s0 + $0x20] sm:$0xff]  ;;  %v53_v9 = vld [vmem:[%s1431_s0 + $0x28] sm:$0xff]  ;;  %v54_v10 = vld [vmem:[%s1431_s0 + $0x30] sm:$0xff] }
   0x9   :  { %v55_v11 = vld [vmem:[%s1431_s0 + $0x38] sm:$0xff]  ;;  %v56_v12 = vld [vmem:[%s1431_s0 + $0x40] sm:$0xff]  ;;  %v344_v14 = vld [vmem:[#allocation2 + $0x70] sm:$0xff] }
   0xa   :  { %199 = vmatpush.msra.mxu0 %v81_v2  ;;  %v345_v13 = vld [vmem:[#allocation2 + $0x78] sm:$0xff]  ;;  %v343_v15 = vld [vmem:[#allocation2 + $0x68] sm:$0xff]  ;;  %v342_v17 = vld [vmem:[#allocation2 + $0x60] sm:$0xff] }
   0xb   :  { %350 = vmatpush.msra.mxu1 %v345_v13  ;;  %v57_v16 = vld [vmem:[%s1431_s0 + $0x48] sm:$0xff]  ;;  %v341_v18 = vld [vmem:[#allocation2 + $0x58] sm:$0xff]  ;;  %v340_v19 = vld [vmem:[#allocation2 + $0x50] sm:$0xff] }
   0xc   :  { %200 = vmatpush.msra.mxu0 %v80_v3  ;;  %v339_v20 = vld [vmem:[#allocation2 + $0x48] sm:$0xff]  ;;  %v58_v21 = vld [vmem:[%s1431_s0 + $0x50] sm:$0xff]  ;;  %v338_v22 = vld [vmem:[#allocation2 + $0x40] sm:$0xff] }
   0xd   :  { %830 = vmatmul.msk.f32.vlgmr.msra.gmra.mxu0 %vm88_vm0, %v48_v4  ;;  %351 = vmatpush.msra.mxu1 %v344_v14  ;;  %v337_v23 = vld [vmem:[#allocation2 + $0x38] sm:$0xff]  ;;  %v336_v24 = vld [vmem:[#allocation2 + $0x30] sm:$0xff]  ;;  %v335_v25 = vld [vmem:[#allocation2 + $0x28] sm:$0xff] }
   0xe   :  { %v59_v26 = vld [vmem:[%s1431_s0 + $0x58] sm:$0xff]  ;;  %v334_v27 = vld [vmem:[#allocation2 + $0x20] sm:$0xff]  ;;  %v332_v29 = vld [vmem:[#allocation2 + $0x10] sm:$0xff] }
   0xf   :  { %352 = vmatpush.msra.mxu1 %v343_v15  ;;  %v333_v28 = vld [vmem:[#allocation2 + $0x18] sm:$0xff]  ;;  %v60_v30 = vld [vmem:[%s1431_s0 + $0x60] sm:$0xff]  ;;  %v331_v31 = vld [vmem:[#allocation2 + $0x8] sm:$0xff] }
  0x10   :  { %v330_v32 = vld [vmem:[#allocation2] sm:$0xff]  ;;  %v61_v33 = vld [vmem:[%s1431_s0 + $0x68] sm:$0xff]  ;;  %v62_v34 = vld [vmem:[%s1431_s0 + $0x70] sm:$0xff] }
  0x11   :  { %353 = vmatpush.msra.mxu1 %v342_v17  ;;  %v63_v35 = vld [vmem:[%s1431_s0 + $0x78] sm:$0xff]  ;;  %v1030_v36 = vld [vmem:[%s1433_s2] ss:$0 sm:$0xff]  ;;  %v65_v42 = vld [vmem:[%s1431_s0 + $0x88] sm:$0xff] }
  0x12   :  { %v64_v38 = vld [vmem:[%s1431_s0 + $0x80] sm:$0xff]  ;;  %v66_v46 = vld [vmem:[%s1431_s0 + $0x90] sm:$0xff]  ;;  %v67_v50 = vld [vmem:[%s1431_s0 + $0x98] sm:$0xff] }
  0x13   :  { %354 = vmatpush.msra.mxu1 %v341_v18  ;;  %v68_v54 = vld [vmem:[%s1431_s0 + $0xa0] sm:$0xff]  ;;  %v69_v58 = vld [vmem:[%s1431_s0 + $0xa8] sm:$0xff]  ;;  %v70_v62 = vld [vmem:[%s1431_s0 + $0xb0] sm:$0xff] }
  0x14   :  { %v71_v2 = vld [vmem:[%s1431_s0 + $0xb8] sm:$0xff]  ;;  %v509_v13 = vld [vmem:[%s1436_s5 + $0x70] sm:$0xff]  ;;  %v508_v15 = vld [vmem:[%s1436_s5 + $0x68] sm:$0xff] }
  0x15   :  { %831 = vmatmul.msk.f32.gmra.mxu0 %vm88_vm0, %v49_v5  ;;  %355 = vmatpush.msra.mxu1 %v340_v19  ;;  %v506_v17 = vld [vmem:[%s1436_s5 + $0x58] sm:$0xff]  ;;  %v74_v19 = vld [vmem:[%s1431_s0 + $0xd0] sm:$0xff] }
  0x17   :  { %356 = vmatpush.msra.mxu1 %v339_v20 }
  0x19   :  { %357 = vmatpush.msra.mxu1 %v338_v22 }
  0x1b   :  { %358 = vmatpush.msra.mxu1 %v337_v23  ;;  %v504_v23 = vld [vmem:[%s1436_s5 + $0x48] sm:$0xff] }
  0x1d   :  { %832 = vmatmul.msk.f32.gmra.mxu0 %vm88_vm0, %v50_v6  ;;  %359 = vmatpush.msra.mxu1 %v336_v24  ;;  %v72_v6 = vld [vmem:[%s1431_s0 + $0xc0] sm:$0xff] }
  0x1e   :  { %v503_v24 = vld [vmem:[%s1436_s5 + $0x40] sm:$0xff] }
  0x1f   :  { %360 = vmatpush.msra.mxu1 %v335_v25  ;;  %v502_v25 = vld [vmem:[%s1436_s5 + $0x38] sm:$0xff] }
  0x21   :  { %361 = vmatpush.msra.mxu1 %v334_v27  ;;  %v75_v27 = vld [vmem:[%s1431_s0 + $0xd8] sm:$0xff] }
  0x23   :  { %362 = vmatpush.msra.mxu1 %v333_v28 }
  0x25   :  { %833 = vmatmul.msk.f32.gmra.mxu0 %vm88_vm0, %v51_v7  ;;  %363 = vmatpush.msra.mxu1 %v332_v29  ;;  %v501_v29 = vld [vmem:[%s1436_s5 + $0x30] sm:$0xff] }
  0x27   :  { %364 = vmatpush.msra.mxu1 %v331_v31  ;;  %v500_v31 = vld [vmem:[%s1436_s5 + $0x28] sm:$0xff] }
  0x29   :  { %365 = vmatpush.msra.mxu1 %v330_v32  ;;  %v499_v32 = vld [vmem:[%s1436_s5 + $0x20] sm:$0xff] }
  0x2d   :  { %834 = vmatmul.msk.f32.gmra.mxu0 %vm88_vm0, %v52_v8 }
  0x35   :  { %835 = vmatmul.msk.f32.gmra.mxu0 %vm88_vm0, %v53_v9  ;;  %v510_v9 = vld [vmem:[%s1436_s5 + $0x78] sm:$0xff] }
  0x36   :  { %515 = vmatpush.msra.mxu2 %v510_v9 }
  0x38   :  { %516 = vmatpush.msra.mxu2 %v509_v13 }
  0x3a   :  { %517 = vmatpush.msra.mxu2 %v508_v15 }
  0x3d   :  { %836 = vmatmul.msk.f32.gmra.mxu0 %vm88_vm0, %v54_v10 }
  0x45   :  { %837 = vmatmul.msk.f32.gmra.mxu0 %vm88_vm0, %v55_v11  ;;  %v73_v11 = vld [vmem:[%s1431_s0 + $0xc8] sm:$0xff] }
  0x4d   :  { %838 = vmatmul.msk.f32.gmra.mxu0 %vm88_vm0, %v56_v12 }
  0x55   :  { %839 = vmatmul.msk.f32.gmra.mxu0 %vm88_vm0, %v57_v16  ;;  %v507_v16 = vld [vmem:[%s1436_s5 + $0x60] sm:$0xff] }
  0x56   :  { %518 = vmatpush.msra.mxu2 %v507_v16 }
  0x58   :  { %519 = vmatpush.msra.mxu2 %v506_v17 }
  0x5d   :  { %840 = vmatmul.msk.f32.gmra.mxu0 %vm88_vm0, %v58_v21  ;;  %v505_v21 = vld [vmem:[%s1436_s5 + $0x50] sm:$0xff] }
  0x5e   :  { %520 = vmatpush.msra.mxu2 %v505_v21 }
  0x60   :  { %521 = vmatpush.msra.mxu2 %v504_v23 }
  0x62   :  { %522 = vmatpush.msra.mxu2 %v503_v24 }
  0x64   :  { %523 = vmatpush.msra.mxu2 %v502_v25 }
  0x65   :  { %841 = vmatmul.msk.f32.gmra.mxu0 %vm88_vm0, %v59_v26 }
  0x66   :  { %524 = vmatpush.msra.mxu2 %v501_v29 }
  0x68   :  { %525 = vmatpush.msra.mxu2 %v500_v31 }
  0x6a   :  { %526 = vmatpush.msra.mxu2 %v499_v32 }
  0x6d   :  { %842 = vmatmul.msk.f32.gmra.mxu0 %vm88_vm0, %v60_v30 }
  0x75   :  { %843 = vmatmul.msk.f32.gmra.mxu0 %vm88_vm0, %v61_v33  ;;  %v498_v33 = vld [vmem:[%s1436_s5 + $0x18] sm:$0xff] }
  0x76   :  { %527 = vmatpush.msra.mxu2 %v498_v33 }
  0x7d   :  { %844 = vmatmul.msk.f32.gmra.mxu0 %vm88_vm0, %v62_v34 }
  0x85   :  { %845 = vmatmul.msk.f32.gmra.mxu0 %vm88_vm0, %v63_v35  ;;  %v76_v35 = vld [vmem:[%s1431_s0 + $0xe0] sm:$0xff] }
  0x8a   :  { %v202_v37 = vpop.f32.mrf.mxu0 }
  0x8b   :  { %v203_v39 = vadd.f32 %v1030_v36, %v202_v37 }
  0x8d   :  { %846 = vmatmul.msk.f32.gmra.mxu0 %vm88_vm0, %v64_v38  ;;  %v298_v40 = vmax.f32 %v203_v39, 0.0  ;;  %v497_v38 = vld [vmem:[%s1436_s5 + $0x10] sm:$0xff] }
  0x8e   :  { %528 = vmatpush.msra.mxu2 %v497_v38 }
  0x8f   :  { %366 = vmatmul.f32.vlgmr.msra.gmra.mxu1 %v298_v40  ;;  %v496_v40 = vld [vmem:[%s1436_s5 + $0x8] sm:$0xff] }
  0x90   :  { %529 = vmatpush.msra.mxu2 %v496_v40 }
  0x92   :  { %v205_v41 = vpop.f32.mrf.mxu0 }
  0x93   :  { %v206_v43 = vadd.f32 %v1030_v36, %v205_v41  ;;  %v495_v41 = vld [vmem:[%s1436_s5] sm:$0xff] }
  0x94   :  { %530 = vmatpush.msra.mxu2 %v495_v41 }
  0x95   :  { %847 = vmatmul.msk.f32.gmra.mxu0 %vm88_vm0, %v65_v42  ;;  %v299_v44 = vmax.f32 %v206_v43, 0.0  ;;  %v77_v43 = vld [vmem:[%s1431_s0 + $0xe8] sm:$0xff] }
  0x97   :  { %369 = vmatmul.f32.gmra.mxu1 %v299_v44 }
  0x9a   :  { %v208_v45 = vpop.f32.mrf.mxu0 }
  0x9b   :  { %v209_v47 = vadd.f32 %v1030_v36, %v208_v45 }
  0x9d   :  { %848 = vmatmul.msk.f32.gmra.mxu0 %vm88_vm0, %v66_v46  ;;  %v300_v48 = vmax.f32 %v209_v47, 0.0  ;;  %v78_v47 = vld [vmem:[%s1431_s0 + $0xf0] sm:$0xff] }
  0x9f   :  { %372 = vmatmul.f32.gmra.mxu1 %v300_v48 }
  0xa2   :  { %v211_v49 = vpop.f32.mrf.mxu0 }
  0xa3   :  { %v212_v51 = vadd.f32 %v1030_v36, %v211_v49 }
  0xa5   :  { %849 = vmatmul.msk.f32.gmra.mxu0 %vm88_vm0, %v67_v50  ;;  %v301_v52 = vmax.f32 %v212_v51, 0.0  ;;  %v79_v51 = vld [vmem:[%s1431_s0 + $0xf8] sm:$0xff] }
  0xa7   :  { %375 = vmatmul.f32.gmra.mxu1 %v301_v52 }
  0xaa   :  { %v214_v53 = vpop.f32.mrf.mxu0 }
  0xab   :  { %v215_v55 = vadd.f32 %v1030_v36, %v214_v53 }
  0xad   :  { %850 = vmatmul.msk.f32.gmra.mxu0 %vm88_vm0, %v68_v54  ;;  %v302_v56 = vmax.f32 %v215_v55, 0.0  ;;  %v1163_v54 = vld [vmem:[%s1435_s4] ss:$0 sm:$0xff] }
  0xaf   :  { %378 = vmatmul.f32.gmra.mxu1 %v302_v56 }
  0xb2   :  { %v217_v57 = vpop.f32.mrf.mxu0 }
  0xb3   :  { %v218_v59 = vadd.f32 %v1030_v36, %v217_v57 }
  0xb5   :  { %851 = vmatmul.msk.f32.gmra.mxu0 %vm88_vm0, %v69_v58  ;;  %v303_v60 = vmax.f32 %v218_v59, 0.0 }
  0xb7   :  { %381 = vmatmul.f32.gmra.mxu1 %v303_v60 }
  0xba   :  { %v220_v61 = vpop.f32.mrf.mxu0 }
  0xbb   :  { %v221_v63 = vadd.f32 %v1030_v36, %v220_v61 }
  0xbd   :  { %852 = vmatmul.msk.f32.gmra.mxu0 %vm88_vm0, %v70_v62  ;;  %v304_v0 = vmax.f32 %v221_v63, 0.0 }
  0xbf   :  { %384 = vmatmul.f32.gmra.mxu1 %v304_v0 }
  0xc2   :  { %v223_v1 = vpop.f32.mrf.mxu0 }
  0xc3   :  { %v224_v3 = vadd.f32 %v1030_v36, %v223_v1 }
  0xc5   :  { %853 = vmatmul.msk.f32.gmra.mxu0 %vm88_vm0, %v71_v2  ;;  %v305_v4 = vmax.f32 %v224_v3, 0.0 }
  0xc7   :  { %387 = vmatmul.f32.gmra.mxu1 %v305_v4 }
  0xca   :  { %v226_v5 = vpop.f32.mrf.mxu0 }
  0xcb   :  { %v227_v7 = vadd.f32 %v1030_v36, %v226_v5 }
  0xcd   :  { %v306_v8 = vmax.f32 %v227_v7, 0.0  ;;  %854 = vmatmul.msk.f32.gmra.mxu0 %vm88_vm0, %v72_v6 }
  0xcf   :  { %390 = vmatmul.f32.gmra.mxu1 %v306_v8 }
  0xd2   :  { %v229_v10 = vpop.f32.mrf.mxu0 }
  0xd3   :  { %v230_v12 = vadd.f32 %v1030_v36, %v229_v10 }
  0xd5   :  { %v307_v14 = vmax.f32 %v230_v12, 0.0  ;;  %855 = vmatmul.msk.f32.gmra.mxu0 %vm88_vm0, %v73_v11 }
  0xd7   :  { %393 = vmatmul.f32.gmra.mxu1 %v307_v14 }
  0xda   :  { %v232_v18 = vpop.f32.mrf.mxu0 }
  0xdb   :  { %v233_v20 = vadd.f32 %v1030_v36, %v232_v18 }
  0xdd   :  { %v308_v22 = vmax.f32 %v233_v20, 0.0  ;;  %856 = vmatmul.msk.f32.gmra.mxu0 %vm88_vm0, %v74_v19 }
  0xdf   :  { %396 = vmatmul.f32.gmra.mxu1 %v308_v22 }
  0xe2   :  { %v235_v26 = vpop.f32.mrf.mxu0 }
  0xe3   :  { %v236_v28 = vadd.f32 %v1030_v36, %v235_v26 }
  0xe5   :  { %v309_v30 = vmax.f32 %v236_v28, 0.0  ;;  %857 = vmatmul.msk.f32.gmra.mxu0 %vm88_vm0, %v75_v27 }
  0xe7   :  { %399 = vmatmul.f32.gmra.mxu1 %v309_v30 }
  0xea   :  { %v238_v34 = vpop.f32.mrf.mxu0 }
  0xeb   :  { %v239_v37 = vadd.f32 %v1030_v36, %v238_v34 }
  0xed   :  { %v310_v39 = vmax.f32 %v239_v37, 0.0  ;;  %858 = vmatmul.msk.f32.gmra.mxu0 %vm88_vm0, %v76_v35 }
  0xef   :  { %402 = vmatmul.f32.gmra.mxu1 %v310_v39 }
  0xf2   :  { %v241_v42 = vpop.f32.mrf.mxu0 }
  0xf3   :  { %v242_v44 = vadd.f32 %v1030_v36, %v241_v42 }
  0xf5   :  { %v311_v45 = vmax.f32 %v242_v44, 0.0  ;;  %859 = vmatmul.msk.f32.gmra.mxu0 %vm88_vm0, %v77_v43 }
  0xf7   :  { %405 = vmatmul.f32.gmra.mxu1 %v311_v45 }
  0xfa   :  { %v244_v46 = vpop.f32.mrf.mxu0 }
  0xfb   :  { %v245_v48 = vadd.f32 %v1030_v36, %v244_v46 }
  0xfd   :  { %v312_v49 = vmax.f32 %v245_v48, 0.0  ;;  %860 = vmatmul.msk.f32.gmra.mxu0 %vm88_vm0, %v78_v47 }
  0xff   :  { %408 = vmatmul.f32.gmra.mxu1 %v312_v49 }
 0x102   :  { %v247_v50 = vpop.f32.mrf.mxu0 }
 0x103   :  { %v248_v52 = vadd.f32 %v1030_v36, %v247_v50 }
 0x105   :  { %v313_v53 = vmax.f32 %v248_v52, 0.0  ;;  %861 = vmatmul.msk.f32.gmra.mxu0 %vm88_vm0, %v79_v51  ;;  %v675_v52 = vld [vmem:[%s1438_s7 + $0x78] sm:$0xff] }
 0x106   :  { %680 = vmatpush.msra.mxu3 %v675_v52 }
 0x107   :  { %411 = vmatmul.f32.gmra.mxu1 %v313_v53 }
 0x10a   :  { %v250_v55 = vpop.f32.mrf.mxu0 }
 0x10b   :  { %v251_v56 = vadd.f32 %v1030_v36, %v250_v55 }
 0x10c   :  { %v367_v57 = vpop.f32.mrf.mxu1 }
 0x10d   :  { %v314_v58 = vmax.f32 %v251_v56, 0.0  ;;  %v368_v59 = vadd.f32 %v1163_v54, %v367_v57  ;;  %v674_v56 = vld [vmem:[%s1438_s7 + $0x70] sm:$0xff] }
 0x10e   :  { %681 = vmatpush.msra.mxu3 %v674_v56 }
 0x10f   :  { %414 = vmatmul.f32.gmra.mxu1 %v314_v58  ;;  %v463_v60 = vmax.f32 %v368_v59, 0.0 }
 0x111   :  { %531 = vmatmul.f32.vlgmr.msra.gmra.mxu2 %v463_v60  ;;  %v673_v60 = vld [vmem:[%s1438_s7 + $0x68] sm:$0xff] }
 0x112   :  { %v253_v61 = vpop.f32.mrf.mxu0  ;;  %682 = vmatpush.msra.mxu3 %v673_v60 }
 0x113   :  { %v254_v62 = vadd.f32 %v1030_v36, %v253_v61 }
 0x114   :  { %v370_v63 = vpop.f32.mrf.mxu1 }
 0x115   :  { %v315_v0 = vmax.f32 %v254_v62, 0.0  ;;  %v371_v1 = vadd.f32 %v1163_v54, %v370_v63  ;;  %v672_v62 = vld [vmem:[%s1438_s7 + $0x60] sm:$0xff]  ;;  %v671_v63 = vld [vmem:[%s1438_s7 + $0x58] sm:$0xff] }
 0x116   :  { %683 = vmatpush.msra.mxu3 %v672_v62 }
 0x117   :  { %417 = vmatmul.f32.gmra.mxu1 %v315_v0  ;;  %v464_v2 = vmax.f32 %v371_v1, 0.0 }
 0x118   :  { %684 = vmatpush.msra.mxu3 %v671_v63 }
 0x119   :  { %534 = vmatmul.f32.gmra.mxu2 %v464_v2  ;;  %v670_v2 = vld [vmem:[%s1438_s7 + $0x50] sm:$0xff] }
 0x11a   :  { %v256_v3 = vpop.f32.mrf.mxu0  ;;  %685 = vmatpush.msra.mxu3 %v670_v2 }
 0x11b   :  { %v257_v4 = vadd.f32 %v1030_v36, %v256_v3 }
 0x11c   :  { %v373_v5 = vpop.f32.mrf.mxu1 }
 0x11d   :  { %v316_v6 = vmax.f32 %v257_v4, 0.0  ;;  %v374_v7 = vadd.f32 %v1163_v54, %v373_v5 }
 0x11f   :  { %420 = vmatmul.f32.gmra.mxu1 %v316_v6  ;;  %v465_v8 = vmax.f32 %v374_v7, 0.0  ;;  %v669_v6 = vld [vmem:[%s1438_s7 + $0x48] sm:$0xff] }
 0x120   :  { %686 = vmatpush.msra.mxu3 %v669_v6 }
 0x121   :  { %537 = vmatmul.f32.gmra.mxu2 %v465_v8  ;;  %v668_v8 = vld [vmem:[%s1438_s7 + $0x40] sm:$0xff] }
 0x122   :  { %v259_v9 = vpop.f32.mrf.mxu0  ;;  %687 = vmatpush.msra.mxu3 %v668_v8 }
 0x123   :  { %v260_v10 = vadd.f32 %v1030_v36, %v259_v9  ;;  %v667_v9 = vld [vmem:[%s1438_s7 + $0x38] sm:$0xff] }
 0x124   :  { %v376_v11 = vpop.f32.mrf.mxu1  ;;  %688 = vmatpush.msra.mxu3 %v667_v9 }
 0x125   :  { %v317_v12 = vmax.f32 %v260_v10, 0.0  ;;  %v377_v13 = vadd.f32 %v1163_v54, %v376_v11 }
 0x127   :  { %423 = vmatmul.f32.gmra.mxu1 %v317_v12  ;;  %v466_v14 = vmax.f32 %v377_v13, 0.0  ;;  %v666_v12 = vld [vmem:[%s1438_s7 + $0x30] sm:$0xff] }
 0x128   :  { %689 = vmatpush.msra.mxu3 %v666_v12 }
 0x129   :  { %540 = vmatmul.f32.gmra.mxu2 %v466_v14 }
 0x12a   :  { %v262_v15 = vpop.f32.mrf.mxu0 }
 0x12b   :  { %v263_v16 = vadd.f32 %v1030_v36, %v262_v15 }
 0x12c   :  { %v379_v17 = vpop.f32.mrf.mxu1 }
 0x12d   :  { %v318_v18 = vmax.f32 %v263_v16, 0.0  ;;  %v380_v19 = vadd.f32 %v1163_v54, %v379_v17  ;;  %v665_v16 = vld [vmem:[%s1438_s7 + $0x28] sm:$0xff] }
 0x12e   :  { %690 = vmatpush.msra.mxu3 %v665_v16 }
 0x12f   :  { %426 = vmatmul.f32.gmra.mxu1 %v318_v18  ;;  %v467_v20 = vmax.f32 %v380_v19, 0.0  ;;  %v664_v18 = vld [vmem:[%s1438_s7 + $0x20] sm:$0xff]  ;;  %v663_v19 = vld [vmem:[%s1438_s7 + $0x18] sm:$0xff] }
 0x130   :  { %691 = vmatpush.msra.mxu3 %v664_v18 }
 0x131   :  { %543 = vmatmul.f32.gmra.mxu2 %v467_v20 }
 0x132   :  { %v265_v21 = vpop.f32.mrf.mxu0  ;;  %692 = vmatpush.msra.mxu3 %v663_v19 }
 0x133   :  { %v266_v22 = vadd.f32 %v1030_v36, %v265_v21 }
 0x134   :  { %v382_v23 = vpop.f32.mrf.mxu1 }
 0x135   :  { %v319_v24 = vmax.f32 %v266_v22, 0.0  ;;  %v383_v25 = vadd.f32 %v1163_v54, %v382_v23  ;;  %v662_v22 = vld [vmem:[%s1438_s7 + $0x10] sm:$0xff] }
 0x136   :  { %693 = vmatpush.msra.mxu3 %v662_v22 }
 0x137   :  { %429 = vmatmul.f32.gmra.mxu1 %v319_v24  ;;  %v468_v26 = vmax.f32 %v383_v25, 0.0 }
 0x139   :  { %546 = vmatmul.f32.gmra.mxu2 %v468_v26  ;;  %v661_v26 = vld [vmem:[%s1438_s7 + $0x8] sm:$0xff] }
 0x13a   :  { %v268_v27 = vpop.f32.mrf.mxu0  ;;  %694 = vmatpush.msra.mxu3 %v661_v26 }
 0x13b   :  { %v269_v28 = vadd.f32 %v1030_v36, %v268_v27 }
 0x13c   :  { %v385_v29 = vpop.f32.mrf.mxu1 }
 0x13d   :  { %v320_v30 = vmax.f32 %v269_v28, 0.0  ;;  %v386_v31 = vadd.f32 %v1163_v54, %v385_v29  ;;  %v660_v28 = vld [vmem:[%s1438_s7] sm:$0xff] }
 0x13e   :  { %695 = vmatpush.msra.mxu3 %v660_v28 }
 0x13f   :  { %432 = vmatmul.f32.gmra.mxu1 %v320_v30  ;;  %v469_v32 = vmax.f32 %v386_v31, 0.0 }
 0x141   :  { %549 = vmatmul.f32.gmra.mxu2 %v469_v32 }
 0x142   :  { %v271_v33 = vpop.f32.mrf.mxu0 }
 0x143   :  { %v272_v34 = vadd.f32 %v1030_v36, %v271_v33 }
 0x144   :  { %v388_v35 = vpop.f32.mrf.mxu1 }
 0x145   :  { %v321_v37 = vmax.f32 %v272_v34, 0.0  ;;  %v389_v38 = vadd.f32 %v1163_v54, %v388_v35 }
 0x147   :  { %435 = vmatmul.f32.gmra.mxu1 %v321_v37  ;;  %v470_v39 = vmax.f32 %v389_v38, 0.0 }
 0x149   :  { %552 = vmatmul.f32.gmra.mxu2 %v470_v39 }
 0x14a   :  { %v274_v40 = vpop.f32.mrf.mxu0 }
 0x14b   :  { %v275_v41 = vadd.f32 %v1030_v36, %v274_v40 }
 0x14c   :  { %v391_v42 = vpop.f32.mrf.mxu1 }
 0x14d   :  { %v322_v43 = vmax.f32 %v275_v41, 0.0  ;;  %v392_v44 = vadd.f32 %v1163_v54, %v391_v42 }
 0x14f   :  { %v471_v45 = vmax.f32 %v392_v44, 0.0  ;;  %438 = vmatmul.f32.gmra.mxu1 %v322_v43 }
 0x151   :  { %555 = vmatmul.f32.gmra.mxu2 %v471_v45  ;;  %v1249_v45 = vld [vmem:[%s1437_s6] ss:$0 sm:$0xff] }
 0x152   :  { %v277_v46 = vpop.f32.mrf.mxu0 }
 0x153   :  { %v278_v47 = vadd.f32 %v1030_v36, %v277_v46 }
 0x154   :  { %v394_v48 = vpop.f32.mrf.mxu1 }
 0x155   :  { %v323_v49 = vmax.f32 %v278_v47, 0.0  ;;  %v395_v50 = vadd.f32 %v1163_v54, %v394_v48 }
 0x157   :  { %v472_v51 = vmax.f32 %v395_v50, 0.0  ;;  %441 = vmatmul.f32.gmra.mxu1 %v323_v49 }
 0x159   :  { %558 = vmatmul.f32.gmra.mxu2 %v472_v51 }
 0x15a   :  { %v280_v53 = vpop.f32.mrf.mxu0 }
 0x15b   :  { %v281_v55 = vadd.f32 %v1030_v36, %v280_v53 }
 0x15c   :  { %v397_v57 = vpop.f32.mrf.mxu1 }
 0x15d   :  { %v324_v58 = vmax.f32 %v281_v55, 0.0  ;;  %v398_v59 = vadd.f32 %v1163_v54, %v397_v57 }
 0x15f   :  { %v473_v61 = vmax.f32 %v398_v59, 0.0  ;;  %444 = vmatmul.f32.gmra.mxu1 %v324_v58 }
 0x161   :  { %561 = vmatmul.f32.gmra.mxu2 %v473_v61 }
 0x162   :  { %v283_v0 = vpop.f32.mrf.mxu0 }
 0x163   :  { %v284_v1 = vadd.f32 %v1030_v36, %v283_v0 }
 0x164   :  { %v400_v3 = vpop.f32.mrf.mxu1 }
 0x165   :  { %v325_v4 = vmax.f32 %v284_v1, 0.0  ;;  %v401_v5 = vadd.f32 %v1163_v54, %v400_v3 }
 0x167   :  { %v474_v7 = vmax.f32 %v401_v5, 0.0  ;;  %447 = vmatmul.f32.gmra.mxu1 %v325_v4 }
 0x169   :  { %564 = vmatmul.f32.gmra.mxu2 %v474_v7 }
 0x16a   :  { %v286_v10 = vpop.f32.mrf.mxu0 }
 0x16b   :  { %v287_v11 = vadd.f32 %v1030_v36, %v286_v10 }
 0x16c   :  { %v403_v13 = vpop.f32.mrf.mxu1 }
 0x16d   :  { %v326_v14 = vmax.f32 %v287_v11, 0.0  ;;  %v404_v15 = vadd.f32 %v1163_v54, %v403_v13 }
 0x16f   :  { %v475_v17 = vmax.f32 %v404_v15, 0.0  ;;  %450 = vmatmul.f32.gmra.mxu1 %v326_v14 }
 0x171   :  { %567 = vmatmul.f32.gmra.mxu2 %v475_v17 }
 0x172   :  { %v289_v20 = vpop.f32.mrf.mxu0 }
 0x173   :  { %v290_v21 = vadd.f32 %v1030_v36, %v289_v20 }
 0x174   :  { %v406_v23 = vpop.f32.mrf.mxu1 }
 0x175   :  { %v327_v24 = vmax.f32 %v290_v21, 0.0  ;;  %v407_v25 = vadd.f32 %v1163_v54, %v406_v23 }
 0x177   :  { %v476_v27 = vmax.f32 %v407_v25, 0.0  ;;  %453 = vmatmul.f32.gmra.mxu1 %v327_v24 }
 0x179   :  { %570 = vmatmul.f32.gmra.mxu2 %v476_v27 }
 0x17a   :  { %v292_v29 = vpop.f32.mrf.mxu0 }
 0x17b   :  { %v293_v30 = vadd.f32 %v1030_v36, %v292_v29 }
 0x17c   :  { %v409_v31 = vpop.f32.mrf.mxu1 }
 0x17d   :  { %v328_v32 = vmax.f32 %v293_v30, 0.0  ;;  %v410_v33 = vadd.f32 %v1163_v54, %v409_v31 }
 0x17f   :  { %v477_v34 = vmax.f32 %v410_v33, 0.0  ;;  %456 = vmatmul.f32.gmra.mxu1 %v328_v32 }
 0x181   :  { %573 = vmatmul.f32.gmra.mxu2 %v477_v34 }
 0x182   :  { %v295_v35 = vpop.f32.mrf.mxu0 }
 0x183   :  { %v296_v37 = vadd.f32 %v1030_v36, %v295_v35 }
 0x184   :  { %v412_v38 = vpop.f32.mrf.mxu1 }
 0x185   :  { %v329_v39 = vmax.f32 %v296_v37, 0.0  ;;  %v413_v40 = vadd.f32 %v1163_v54, %v412_v38 }
 0x187   :  { %v478_v41 = vmax.f32 %v413_v40, 0.0  ;;  %459 = vmatmul.f32.gmra.mxu1 %v329_v39 }
 0x189   :  { %576 = vmatmul.f32.gmra.mxu2 %v478_v41 }
 0x18c   :  { %v415_v42 = vpop.f32.mrf.mxu1 }
 0x18d   :  { %v416_v43 = vadd.f32 %v1163_v54, %v415_v42 }
 0x18f   :  { %v479_v44 = vmax.f32 %v416_v43, 0.0 }
 0x191   :  { %579 = vmatmul.f32.gmra.mxu2 %v479_v44 }
 0x194   :  { %v418_v46 = vpop.f32.mrf.mxu1  ;;  %v532_v47 = vpop.f32.mrf.mxu2 }
 0x195   :  { %v419_v36 = vadd.f32 %v1163_v54, %v418_v46  ;;  %v533_v48 = vadd.f32 %v1249_v45, %v532_v47 }
 0x197   :  { %v480_v49 = vmax.f32 %v419_v36, 0.0  ;;  %v628_v50 = vmax.f32 %v533_v48, 0.0 }
 0x199   :  { %582 = vmatmul.f32.gmra.mxu2 %v480_v49  ;;  %696 = vmatmul.f32.vlgmr.msra.gmra.mxu3 %v628_v50 }
 0x19c   :  { %v421_v51 = vpop.f32.mrf.mxu1  ;;  %v535_v52 = vpop.f32.mrf.mxu2 }
 0x19d   :  { %v422_v53 = vadd.f32 %v1163_v54, %v421_v51  ;;  %v536_v55 = vadd.f32 %v1249_v45, %v535_v52 }
 0x19f   :  { %v481_v56 = vmax.f32 %v422_v53, 0.0  ;;  %v629_v57 = vmax.f32 %v536_v55, 0.0 }
 0x1a1   :  { %585 = vmatmul.f32.gmra.mxu2 %v481_v56  ;;  %699 = vmatmul.f32.gmra.mxu3 %v629_v57 }
 0x1a4   :  { %v424_v58 = vpop.f32.mrf.mxu1  ;;  %v538_v59 = vpop.f32.mrf.mxu2 }
 0x1a5   :  { %v425_v60 = vadd.f32 %v1163_v54, %v424_v58  ;;  %v539_v61 = vadd.f32 %v1249_v45, %v538_v59 }
 0x1a7   :  { %v482_v62 = vmax.f32 %v425_v60, 0.0  ;;  %v630_v63 = vmax.f32 %v539_v61, 0.0 }
 0x1a9   :  { %588 = vmatmul.f32.gmra.mxu2 %v482_v62  ;;  %702 = vmatmul.f32.gmra.mxu3 %v630_v63 }
 0x1ac   :  { %v427_v0 = vpop.f32.mrf.mxu1  ;;  %v541_v1 = vpop.f32.mrf.mxu2 }
 0x1ad   :  { %v428_v2 = vadd.f32 %v1163_v54, %v427_v0  ;;  %v542_v3 = vadd.f32 %v1249_v45, %v541_v1 }
 0x1af   :  { %v483_v4 = vmax.f32 %v428_v2, 0.0  ;;  %v631_v5 = vmax.f32 %v542_v3, 0.0 }
 0x1b1   :  { %591 = vmatmul.f32.gmra.mxu2 %v483_v4  ;;  %705 = vmatmul.f32.gmra.mxu3 %v631_v5 }
 0x1b4   :  { %v430_v6 = vpop.f32.mrf.mxu1  ;;  %v544_v7 = vpop.f32.mrf.mxu2 }
 0x1b5   :  { %v431_v8 = vadd.f32 %v1163_v54, %v430_v6  ;;  %v545_v9 = vadd.f32 %v1249_v45, %v544_v7 }
 0x1b7   :  { %v484_v10 = vmax.f32 %v431_v8, 0.0  ;;  %v632_v11 = vmax.f32 %v545_v9, 0.0 }
 0x1b9   :  { %594 = vmatmul.f32.gmra.mxu2 %v484_v10  ;;  %708 = vmatmul.f32.gmra.mxu3 %v632_v11 }
 0x1bc   :  { %v433_v12 = vpop.f32.mrf.mxu1  ;;  %v547_v13 = vpop.f32.mrf.mxu2 }
 0x1bd   :  { %v434_v14 = vadd.f32 %v1163_v54, %v433_v12  ;;  %v548_v15 = vadd.f32 %v1249_v45, %v547_v13 }
 0x1bf   :  { %v485_v16 = vmax.f32 %v434_v14, 0.0  ;;  %v633_v17 = vmax.f32 %v548_v15, 0.0 }
 0x1c1   :  { %597 = vmatmul.f32.gmra.mxu2 %v485_v16  ;;  %711 = vmatmul.f32.gmra.mxu3 %v633_v17 }
 0x1c4   :  { %v436_v18 = vpop.f32.mrf.mxu1  ;;  %v550_v19 = vpop.f32.mrf.mxu2 }
 0x1c5   :  { %v437_v20 = vadd.f32 %v1163_v54, %v436_v18  ;;  %v551_v21 = vadd.f32 %v1249_v45, %v550_v19 }
 0x1c7   :  { %v486_v22 = vmax.f32 %v437_v20, 0.0  ;;  %v634_v23 = vmax.f32 %v551_v21, 0.0 }
 0x1c9   :  { %600 = vmatmul.f32.gmra.mxu2 %v486_v22  ;;  %714 = vmatmul.f32.gmra.mxu3 %v634_v23 }
 0x1cc   :  { %v439_v24 = vpop.f32.mrf.mxu1  ;;  %v553_v25 = vpop.f32.mrf.mxu2 }
 0x1cd   :  { %v440_v26 = vadd.f32 %v1163_v54, %v439_v24  ;;  %v554_v27 = vadd.f32 %v1249_v45, %v553_v25 }
 0x1cf   :  { %v487_v28 = vmax.f32 %v440_v26, 0.0  ;;  %v635_v29 = vmax.f32 %v554_v27, 0.0 }
 0x1d1   :  { %603 = vmatmul.f32.gmra.mxu2 %v487_v28  ;;  %717 = vmatmul.f32.gmra.mxu3 %v635_v29 }
 0x1d4   :  { %v442_v30 = vpop.f32.mrf.mxu1  ;;  %v556_v31 = vpop.f32.mrf.mxu2 }
 0x1d5   :  { %v443_v32 = vadd.f32 %v1163_v54, %v442_v30  ;;  %v557_v33 = vadd.f32 %v1249_v45, %v556_v31 }
 0x1d7   :  { %v488_v34 = vmax.f32 %v443_v32, 0.0  ;;  %v636_v35 = vmax.f32 %v557_v33, 0.0 }
 0x1d9   :  { %606 = vmatmul.f32.gmra.mxu2 %v488_v34  ;;  %720 = vmatmul.f32.gmra.mxu3 %v636_v35 }
 0x1dc   :  { %v445_v37 = vpop.f32.mrf.mxu1  ;;  %v559_v38 = vpop.f32.mrf.mxu2 }
 0x1dd   :  { %v446_v39 = vadd.f32 %v1163_v54, %v445_v37  ;;  %v560_v40 = vadd.f32 %v1249_v45, %v559_v38 }
 0x1df   :  { %v489_v41 = vmax.f32 %v446_v39, 0.0  ;;  %v637_v42 = vmax.f32 %v560_v40, 0.0 }
 0x1e1   :  { %609 = vmatmul.f32.gmra.mxu2 %v489_v41  ;;  %723 = vmatmul.f32.gmra.mxu3 %v637_v42 }
 0x1e4   :  { %v448_v43 = vpop.f32.mrf.mxu1  ;;  %v562_v44 = vpop.f32.mrf.mxu2 }
 0x1e5   :  { %v449_v46 = vadd.f32 %v1163_v54, %v448_v43  ;;  %v563_v47 = vadd.f32 %v1249_v45, %v562_v44 }
 0x1e7   :  { %v490_v36 = vmax.f32 %v449_v46, 0.0  ;;  %v638_v48 = vmax.f32 %v563_v47, 0.0 }
 0x1e9   :  { %612 = vmatmul.f32.gmra.mxu2 %v490_v36  ;;  %726 = vmatmul.f32.gmra.mxu3 %v638_v48 }
 0x1ec   :  { %v451_v49 = vpop.f32.mrf.mxu1  ;;  %v565_v50 = vpop.f32.mrf.mxu2 }
 0x1ed   :  { %v452_v51 = vadd.f32 %v1163_v54, %v451_v49  ;;  %v566_v52 = vadd.f32 %v1249_v45, %v565_v50 }
 0x1ef   :  { %v491_v53 = vmax.f32 %v452_v51, 0.0  ;;  %v639_v55 = vmax.f32 %v566_v52, 0.0 }
 0x1f1   :  { %615 = vmatmul.f32.gmra.mxu2 %v491_v53  ;;  %729 = vmatmul.f32.gmra.mxu3 %v639_v55 }
 0x1f4   :  { %v454_v56 = vpop.f32.mrf.mxu1  ;;  %v568_v57 = vpop.f32.mrf.mxu2 }
 0x1f5   :  { %v455_v58 = vadd.f32 %v1163_v54, %v454_v56  ;;  %v569_v59 = vadd.f32 %v1249_v45, %v568_v57 }
 0x1f7   :  { %v492_v60 = vmax.f32 %v455_v58, 0.0  ;;  %v640_v61 = vmax.f32 %v569_v59, 0.0 }
 0x1f9   :  { %618 = vmatmul.f32.gmra.mxu2 %v492_v60  ;;  %732 = vmatmul.f32.gmra.mxu3 %v640_v61 }
 0x1fc   :  { %v457_v62 = vpop.f32.mrf.mxu1  ;;  %v571_v63 = vpop.f32.mrf.mxu2 }
 0x1fd   :  { %v458_v0 = vadd.f32 %v1163_v54, %v457_v62  ;;  %v572_v1 = vadd.f32 %v1249_v45, %v571_v63 }
 0x1ff   :  { %v493_v2 = vmax.f32 %v458_v0, 0.0  ;;  %v641_v3 = vmax.f32 %v572_v1, 0.0 }
 0x201   :  { %621 = vmatmul.f32.gmra.mxu2 %v493_v2  ;;  %735 = vmatmul.f32.gmra.mxu3 %v641_v3 }
 0x204   :  { %v460_v4 = vpop.f32.mrf.mxu1  ;;  %v574_v5 = vpop.f32.mrf.mxu2 }
 0x205   :  { %v461_v6 = vadd.f32 %v1163_v54, %v460_v4  ;;  %v575_v7 = vadd.f32 %v1249_v45, %v574_v5  ;;  %v1286_v54 = vld [vmem:[%s1439_s8] ss:$0 sm:$0xff] }
 0x207   :  { %v494_v8 = vmax.f32 %v461_v6, 0.0  ;;  %v642_v9 = vmax.f32 %v575_v7, 0.0 }
 0x209   :  { %624 = vmatmul.f32.gmra.mxu2 %v494_v8  ;;  %738 = vmatmul.f32.gmra.mxu3 %v642_v9 }
 0x20c   :  { %v577_v10 = vpop.f32.mrf.mxu2 }
 0x20d   :  { %v578_v11 = vadd.f32 %v1249_v45, %v577_v10 }
 0x20f   :  { %v643_v12 = vmax.f32 %v578_v11, 0.0 }
 0x211   :  { %741 = vmatmul.f32.gmra.mxu3 %v643_v12 }
 0x214   :  { %v580_v13 = vpop.f32.mrf.mxu2 }
 0x215   :  { %v581_v14 = vadd.f32 %v1249_v45, %v580_v13 }
 0x217   :  { %v644_v15 = vmax.f32 %v581_v14, 0.0 }
 0x219   :  { %744 = vmatmul.f32.gmra.mxu3 %v644_v15 }
 0x21c   :  { %v583_v16 = vpop.f32.mrf.mxu2  ;;  %v697_v17 = vpop.f32.mrf.mxu3 }
 0x21d   :  { %v584_v18 = vadd.f32 %v1249_v45, %v583_v16  ;;  %v698_v19 = vadd.f32 %v1286_v54, %v697_v17 }
 0x21f   :  { %v645_v20 = vmax.f32 %v584_v18, 0.0  ;;  %793 = vst [vmem:[%s1440_s9] sm:$0xff] %v698_v19 }
 0x221   :  { %747 = vmatmul.f32.gmra.mxu3 %v645_v20 }
 0x224   :  { %v586_v21 = vpop.f32.mrf.mxu2  ;;  %v700_v22 = vpop.f32.mrf.mxu3 }
 0x225   :  { %v587_v23 = vadd.f32 %v1249_v45, %v586_v21  ;;  %v701_v24 = vadd.f32 %v1286_v54, %v700_v22 }
 0x227   :  { %v646_v25 = vmax.f32 %v587_v23, 0.0  ;;  %794 = vst [vmem:[%s1440_s9 + $0x8] sm:$0xff] %v701_v24 }
 0x229   :  { %750 = vmatmul.f32.gmra.mxu3 %v646_v25 }
 0x22c   :  { %v589_v26 = vpop.f32.mrf.mxu2  ;;  %v703_v27 = vpop.f32.mrf.mxu3 }
 0x22d   :  { %v590_v28 = vadd.f32 %v1249_v45, %v589_v26  ;;  %v704_v29 = vadd.f32 %v1286_v54, %v703_v27 }
 0x22f   :  { %v647_v30 = vmax.f32 %v590_v28, 0.0  ;;  %795 = vst [vmem:[%s1440_s9 + $0x10] sm:$0xff] %v704_v29 }
 0x231   :  { %753 = vmatmul.f32.gmra.mxu3 %v647_v30 }
 0x234   :  { %v592_v31 = vpop.f32.mrf.mxu2  ;;  %v706_v32 = vpop.f32.mrf.mxu3 }
 0x235   :  { %v593_v33 = vadd.f32 %v1249_v45, %v592_v31  ;;  %v707_v34 = vadd.f32 %v1286_v54, %v706_v32 }
 0x237   :  { %v648_v35 = vmax.f32 %v593_v33, 0.0  ;;  %796 = vst [vmem:[%s1440_s9 + $0x18] sm:$0xff] %v707_v34 }
 0x239   :  { %756 = vmatmul.f32.gmra.mxu3 %v648_v35 }
 0x23c   :  { %v595_v37 = vpop.f32.mrf.mxu2  ;;  %v709_v38 = vpop.f32.mrf.mxu3 }
 0x23d   :  { %v596_v39 = vadd.f32 %v1249_v45, %v595_v37  ;;  %v710_v40 = vadd.f32 %v1286_v54, %v709_v38 }
 0x23f   :  { %v649_v41 = vmax.f32 %v596_v39, 0.0  ;;  %797 = vst [vmem:[%s1440_s9 + $0x20] sm:$0xff] %v710_v40 }
 0x241   :  { %759 = vmatmul.f32.gmra.mxu3 %v649_v41 }
 0x244   :  { %v598_v42 = vpop.f32.mrf.mxu2  ;;  %v712_v43 = vpop.f32.mrf.mxu3 }
 0x245   :  { %v599_v44 = vadd.f32 %v1249_v45, %v598_v42  ;;  %v713_v46 = vadd.f32 %v1286_v54, %v712_v43 }
 0x247   :  { %v650_v47 = vmax.f32 %v599_v44, 0.0  ;;  %798 = vst [vmem:[%s1440_s9 + $0x28] sm:$0xff] %v713_v46 }
 0x249   :  { %762 = vmatmul.f32.gmra.mxu3 %v650_v47 }
 0x24c   :  { %v601_v36 = vpop.f32.mrf.mxu2  ;;  %v715_v48 = vpop.f32.mrf.mxu3 }
 0x24d   :  { %v602_v49 = vadd.f32 %v1249_v45, %v601_v36  ;;  %v716_v50 = vadd.f32 %v1286_v54, %v715_v48 }
 0x24f   :  { %v651_v51 = vmax.f32 %v602_v49, 0.0  ;;  %799 = vst [vmem:[%s1440_s9 + $0x30] sm:$0xff] %v716_v50 }
 0x251   :  { %765 = vmatmul.f32.gmra.mxu3 %v651_v51 }
 0x254   :  { %v604_v52 = vpop.f32.mrf.mxu2  ;;  %v718_v53 = vpop.f32.mrf.mxu3 }
 0x255   :  { %v605_v55 = vadd.f32 %v1249_v45, %v604_v52  ;;  %v719_v56 = vadd.f32 %v1286_v54, %v718_v53 }
 0x257   :  { %v652_v57 = vmax.f32 %v605_v55, 0.0  ;;  %800 = vst [vmem:[%s1440_s9 + $0x38] sm:$0xff] %v719_v56 }
 0x259   :  { %768 = vmatmul.f32.gmra.mxu3 %v652_v57 }
 0x25c   :  { %v607_v58 = vpop.f32.mrf.mxu2  ;;  %v721_v59 = vpop.f32.mrf.mxu3 }
 0x25d   :  { %v608_v60 = vadd.f32 %v1249_v45, %v607_v58  ;;  %v722_v61 = vadd.f32 %v1286_v54, %v721_v59 }
 0x25f   :  { %v653_v62 = vmax.f32 %v608_v60, 0.0  ;;  %801 = vst [vmem:[%s1440_s9 + $0x40] sm:$0xff] %v722_v61 }
 0x261   :  { %771 = vmatmul.f32.gmra.mxu3 %v653_v62 }
 0x264   :  { %v610_v63 = vpop.f32.mrf.mxu2  ;;  %v724_v0 = vpop.f32.mrf.mxu3 }
 0x265   :  { %v611_v1 = vadd.f32 %v1249_v45, %v610_v63  ;;  %v725_v2 = vadd.f32 %v1286_v54, %v724_v0 }
 0x267   :  { %v654_v3 = vmax.f32 %v611_v1, 0.0  ;;  %802 = vst [vmem:[%s1440_s9 + $0x48] sm:$0xff] %v725_v2 }
 0x269   :  { %774 = vmatmul.f32.gmra.mxu3 %v654_v3 }
 0x26c   :  { %v613_v4 = vpop.f32.mrf.mxu2  ;;  %v727_v5 = vpop.f32.mrf.mxu3 }
 0x26d   :  { %v614_v6 = vadd.f32 %v1249_v45, %v613_v4  ;;  %v728_v7 = vadd.f32 %v1286_v54, %v727_v5 }
 0x26f   :  { %v655_v8 = vmax.f32 %v614_v6, 0.0  ;;  %803 = vst [vmem:[%s1440_s9 + $0x50] sm:$0xff] %v728_v7 }
 0x271   :  { %777 = vmatmul.f32.gmra.mxu3 %v655_v8 }
 0x274   :  { %v616_v9 = vpop.f32.mrf.mxu2  ;;  %v730_v10 = vpop.f32.mrf.mxu3 }
 0x275   :  { %v617_v11 = vadd.f32 %v1249_v45, %v616_v9  ;;  %v731_v12 = vadd.f32 %v1286_v54, %v730_v10 }
 0x277   :  { %v656_v13 = vmax.f32 %v617_v11, 0.0  ;;  %804 = vst [vmem:[%s1440_s9 + $0x58] sm:$0xff] %v731_v12 }
 0x279   :  { %780 = vmatmul.f32.gmra.mxu3 %v656_v13 }
 0x27c   :  { %v619_v14 = vpop.f32.mrf.mxu2  ;;  %v733_v15 = vpop.f32.mrf.mxu3 }
 0x27d   :  { %v620_v16 = vadd.f32 %v1249_v45, %v619_v14  ;;  %v734_v17 = vadd.f32 %v1286_v54, %v733_v15 }
 0x27f   :  { %v657_v18 = vmax.f32 %v620_v16, 0.0  ;;  %805 = vst [vmem:[%s1440_s9 + $0x60] sm:$0xff] %v734_v17 }
 0x281   :  { %783 = vmatmul.f32.gmra.mxu3 %v657_v18 }
 0x284   :  { %v622_v19 = vpop.f32.mrf.mxu2  ;;  %v736_v20 = vpop.f32.mrf.mxu3 }
 0x285   :  { %v623_v21 = vadd.f32 %v1249_v45, %v622_v19  ;;  %v737_v22 = vadd.f32 %v1286_v54, %v736_v20 }
 0x287   :  { %v658_v23 = vmax.f32 %v623_v21, 0.0  ;;  %806 = vst [vmem:[%s1440_s9 + $0x68] sm:$0xff] %v737_v22 }
 0x289   :  { %786 = vmatmul.f32.gmra.mxu3 %v658_v23 }
 0x28c   :  { %v625_v24 = vpop.f32.mrf.mxu2  ;;  %v739_v25 = vpop.f32.mrf.mxu3 }
 0x28d   :  { %v626_v26 = vadd.f32 %v1249_v45, %v625_v24  ;;  %v740_v27 = vadd.f32 %v1286_v54, %v739_v25 }
 0x28f   :  { %v659_v28 = vmax.f32 %v626_v26, 0.0  ;;  %807 = vst [vmem:[%s1440_s9 + $0x70] sm:$0xff] %v740_v27 }
 0x291   :  { %789 = vmatmul.f32.gmra.mxu3 %v659_v28 }
 0x294   :  { %v742_v29 = vpop.f32.mrf.mxu3 }
 0x295   :  { %v743_v30 = vadd.f32 %v1286_v54, %v742_v29 }
 0x297   :  { %808 = vst [vmem:[%s1440_s9 + $0x78] sm:$0xff] %v743_v30 }
 0x29c   :  { %v745_v31 = vpop.f32.mrf.mxu3 }
 0x29d   :  { %v746_v32 = vadd.f32 %v1286_v54, %v745_v31 }
 0x29f   :  { %809 = vst [vmem:[%s1440_s9 + $0x80] sm:$0xff] %v746_v32 }
 0x2a4   :  { %v748_v45 = vpop.f32.mrf.mxu3 }
 0x2a5   :  { %v749_v33 = vadd.f32 %v1286_v54, %v748_v45 }
 0x2a7   :  { %810 = vst [vmem:[%s1440_s9 + $0x88] sm:$0xff] %v749_v33 }
 0x2ac   :  { %v751_v34 = vpop.f32.mrf.mxu3 }
 0x2ad   :  { %v752_v35 = vadd.f32 %v1286_v54, %v751_v34 }
 0x2af   :  { %811 = vst [vmem:[%s1440_s9 + $0x90] sm:$0xff] %v752_v35 }
 0x2b4   :  { %v754_v37 = vpop.f32.mrf.mxu3 }
 0x2b5   :  { %v755_v38 = vadd.f32 %v1286_v54, %v754_v37 }
 0x2b7   :  { %812 = vst [vmem:[%s1440_s9 + $0x98] sm:$0xff] %v755_v38 }
 0x2bc   :  { %v757_v39 = vpop.f32.mrf.mxu3 }
 0x2bd   :  { %v758_v40 = vadd.f32 %v1286_v54, %v757_v39 }
 0x2bf   :  { %813 = vst [vmem:[%s1440_s9 + $0xa0] sm:$0xff] %v758_v40 }
 0x2c4   :  { %v760_v41 = vpop.f32.mrf.mxu3 }
 0x2c5   :  { %v761_v42 = vadd.f32 %v1286_v54, %v760_v41 }
 0x2c7   :  { %814 = vst [vmem:[%s1440_s9 + $0xa8] sm:$0xff] %v761_v42 }
 0x2cc   :  { %v763_v43 = vpop.f32.mrf.mxu3 }
 0x2cd   :  { %v764_v44 = vadd.f32 %v1286_v54, %v763_v43 }
 0x2cf   :  { %815 = vst [vmem:[%s1440_s9 + $0xb0] sm:$0xff] %v764_v44 }
 0x2d4   :  { %v766_v46 = vpop.f32.mrf.mxu3 }
 0x2d5   :  { %v767_v47 = vadd.f32 %v1286_v54, %v766_v46 }
 0x2d7   :  { %816 = vst [vmem:[%s1440_s9 + $0xb8] sm:$0xff] %v767_v47 }
 0x2dc   :  { %v769_v36 = vpop.f32.mrf.mxu3 }
 0x2dd   :  { %v770_v48 = vadd.f32 %v1286_v54, %v769_v36 }
 0x2df   :  { %817 = vst [vmem:[%s1440_s9 + $0xc0] sm:$0xff] %v770_v48 }
 0x2e4   :  { %v772_v49 = vpop.f32.mrf.mxu3 }
 0x2e5   :  { %v773_v50 = vadd.f32 %v1286_v54, %v772_v49 }
 0x2e7   :  { %818 = vst [vmem:[%s1440_s9 + $0xc8] sm:$0xff] %v773_v50 }
 0x2ec   :  { %v775_v51 = vpop.f32.mrf.mxu3 }
 0x2ed   :  { %v776_v52 = vadd.f32 %v1286_v54, %v775_v51 }
 0x2ef   :  { %819 = vst [vmem:[%s1440_s9 + $0xd0] sm:$0xff] %v776_v52 }
 0x2f4   :  { %v778_v53 = vpop.f32.mrf.mxu3 }
 0x2f5   :  { %v779_v55 = vadd.f32 %v1286_v54, %v778_v53 }
 0x2f7   :  { %820 = vst [vmem:[%s1440_s9 + $0xd8] sm:$0xff] %v779_v55 }
 0x2fc   :  { %v781_v56 = vpop.f32.mrf.mxu3 }
 0x2fd   :  { %v782_v57 = vadd.f32 %v1286_v54, %v781_v56 }
 0x2ff   :  { %821 = vst [vmem:[%s1440_s9 + $0xe0] sm:$0xff] %v782_v57 }
 0x304   :  { %v784_v58 = vpop.f32.mrf.mxu3 }
 0x305   :  { %v785_v59 = vadd.f32 %v1286_v54, %v784_v58 }
 0x307   :  { %822 = vst [vmem:[%s1440_s9 + $0xe8] sm:$0xff] %v785_v59 }
 0x30c   :  { %v787_v60 = vpop.f32.mrf.mxu3 }
 0x30d   :  { %v788_v61 = vadd.f32 %v1286_v54, %v787_v60 }
 0x30f   :  { %823 = vst [vmem:[%s1440_s9 + $0xf0] sm:$0xff] %v788_v61 }
 0x314   :  { %v790_v62 = vpop.f32.mrf.mxu3 }
 0x315   :  { %v791_v63 = vadd.f32 %v1286_v54, %v790_v62 }
 0x317   :  { %824 = vst [vmem:[%s1440_s9 + $0xf8] sm:$0xff] %v791_v63 }
 0x318   :  { %829 = vsyncpa [#allocation3], 1 }

</bundles_post_ra>
